<compile_context>
chip_gen: v7x
topology: tpu7x:2x2x1
jax: 0.10.0
libtpu: 0.0.40
codegen_flags: <defaults>
</compile_context>

<pallas_src>
import functools
import numpy as np
import jax
import jax.numpy as jnp
from jax import lax
from jax.experimental import pallas as pl
from jax.experimental.pallas import tpu as pltpu


def _rup(x, m):
    return (x + m - 1) // m * m


# --------------------------------------------------------------------------
# Pallas kernels
# --------------------------------------------------------------------------

def _conv_bn_kernel(x_ref, w_ref, s_ref, c_ref, *rest, offsets, relu, has_res):
    """Direct conv = sum over taps of shifted GEMMs, fused BN(+res)(+ReLU).

    x_ref : (Mx, Cin)    bf16  flattened (padded / space-to-depth'd) input
    w_ref : (T, Cin, tn) bf16  packed weights for this Cout block (T taps)
    s_ref : (1, tn)      f32   folded BN scale
    c_ref : (1, tn)      f32   folded BN bias
    r_ref : (Mo, tn)     bf16  optional residual (1x1 convs only)
    o_ref : (Mo, tn)     bf16  output block
    acc   : (Mo, tn)     f32   VMEM scratch accumulator
    """
    if has_res:
        r_ref, o_ref, acc_ref = rest
    else:
        o_ref, acc_ref = rest
    mo = o_ref.shape[0]

    if len(offsets) == 1:
        # 1x1 conv: single MXU matmul, no accumulator round-trip needed.
        acc = jnp.dot(x_ref[pl.ds(offsets[0], mo), :], w_ref[0],
                      preferred_element_type=jnp.float32)
    else:
        for t, ofs in enumerate(offsets):
            a = x_ref[pl.ds(ofs, mo), :]          # static shifted row window
            d = jnp.dot(a, w_ref[t], preferred_element_type=jnp.float32)
            if t == 0:
                acc_ref[...] = d
            else:
                acc_ref[...] += d
        acc = acc_ref[...]

    y = acc * s_ref[...] + c_ref[...]
    if has_res:
        y = y + r_ref[...].astype(jnp.float32)
    if relu:
        y = jnp.maximum(y, 0.0)
    o_ref[...] = y.astype(o_ref.dtype)


def _head_kernel(x_ref, w_ref, b_ref, o_ref):
    # x_ref: (N, HW, C) bf16 -> global average pool + linear + softmax (f32).
    pooled = jnp.mean(x_ref[...].astype(jnp.float32), axis=1)          # (N, C)
    logits = jnp.dot(pooled, w_ref[...],
                     preferred_element_type=jnp.float32) + b_ref[...]
    m = jnp.max(logits, axis=-1, keepdims=True)
    e = jnp.exp(logits - m)
    o_ref[...] = (e / jnp.sum(e, axis=-1, keepdims=True)).astype(o_ref.dtype)


# --------------------------------------------------------------------------
# Pallas wrappers
# --------------------------------------------------------------------------

def _direct_conv_bn(x4, w_pk, scale, bias, k, relu, residual=None):
    """Stride-1 kxk conv + folded BN (+residual)(+ReLU).

    x4 is the (already conv-padded / space-to-depth'd) NHWC bf16 input.  The
    kernel over-computes rows in padded coordinates (so every tap is a plain
    shifted window of one flattened input copy); valid rows are cropped after.
    """
    n, hp, wp, cin = x4.shape
    t, cin_w, cout = w_pk.shape
    assert t == k * k and cin_w == cin
    ho, wo = hp - k + 1, wp - k + 1
    mx = n * hp * wp
    mo = mx if k == 1 else mx - (k - 1) * (wp + 1)
    offsets = tuple(dy * wp + dx for dy in range(k) for dx in range(k))

    x2 = x4.reshape(mx, cin)                # free row-major reshape (no copy)
    tn = min(256, cout)                     # lane-dense, >=2 blocks when Cout>=512
    assert cout % tn == 0
    nblk = cout // tn

    in_specs = [pl.BlockSpec((mx, cin), lambda j: (0, 0)),
                pl.BlockSpec((t, cin, tn), lambda j: (0, 0, j)),
                pl.BlockSpec((1, tn), lambda j: (0, j)),
                pl.BlockSpec((1, tn), lambda j: (0, j))]
    args = [x2, w_pk, scale, bias]
    has_res = residual is not None
    if has_res:
        assert k == 1                       # residual is fused only into 1x1 conv3
        in_specs.append(pl.BlockSpec((mo, tn), lambda j: (0, j)))
        args.append(residual.reshape(mo, cout))

    out2 = pl.pallas_call(
        functools.partial(_conv_bn_kernel, offsets=offsets, relu=relu,
                          has_res=has_res),
        out_shape=jax.ShapeDtypeStruct((mo, cout), jnp.bfloat16),
        grid_spec=pltpu.PrefetchScalarGridSpec(
            num_scalar_prefetch=0,
            grid=(nblk,),
            in_specs=in_specs,
            out_specs=pl.BlockSpec((mo, tn), lambda j: (0, j)),
            scratch_shapes=[pltpu.VMEM((mo, tn), jnp.float32)]),
        compiler_params=pltpu.CompilerParams(
            dimension_semantics=("parallel",),
            vmem_limit_bytes=48 * 1024 * 1024),   # fits v7x's 64 MiB with headroom
    )(*args)

    if k == 1:
        return out2.reshape(n, ho, wo, cout)
    # crop the over-computed (garbage) rows back to the valid output window
    full = jnp.pad(out2, ((0, mx - mo), (0, 0)))
    return full.reshape(n, hp, wp, cout)[:, :ho, :wo, :]


def _space_to_depth2(x):
    """(N, H, W, C) -> (N, H//2, W//2, 4C); channel order (r, s, c) matches
    the weight folding in _s2d_weight."""
    n, h, w, c = x.shape
    xr = x.reshape(n, h // 2, 2, w // 2, 2, c)
    return jnp.transpose(xr, (0, 1, 3, 2, 4, 5)).reshape(n, h // 2, w // 2, 4 * c)


def conv2d_bn(x, p, ksize, stride, pad, relu=True, residual=None):
    """NHWC bf16 Conv2d(bias=False)+BatchNorm(+residual)(+ReLU), pre-packed p."""
    if pad:
        x = jnp.pad(x, ((0, 0), (pad, pad), (pad, pad), (0, 0)))
    if stride == 2:
        if ksize == 1:
            x = x[:, ::2, ::2, :]                        # 1x1/s2 downsample
            k_eff = 1
        else:
            _, hp, wp, _ = x.shape
            if (hp % 2) or (wp % 2):
                x = jnp.pad(x, ((0, 0), (0, hp % 2), (0, wp % 2), (0, 0)))
            x = _space_to_depth2(x)                      # one input-sized copy
            k_eff = (ksize + 1) // 2                     # stride-2 -> stride-1 conv
    else:
        k_eff = ksize
    return _direct_conv_bn(x, p['w'], p['s'], p['b'], k_eff, relu, residual)


def maxpool_3x3_s2p1(x):
    """nn.MaxPool2d(3, stride=2, padding=1) on NHWC.
    Plain-JAX 9-way max (XLA fuses it into one pass; no 9x stacked copy)."""
    n, h, w, c = x.shape
    ho, wo = (h - 1) // 2 + 1, (w - 1) // 2 + 1
    xp = jnp.pad(x, ((0, 0), (1, 1), (1, 1), (0, 0)),
                 constant_values=-jnp.inf)
    out = None
    for dy in range(3):
        for dx in range(3):
            v = xp[:, dy:dy + 2 * ho - 1:2, dx:dx + 2 * wo - 1:2, :]
            out = v if out is None else jnp.maximum(out, v)
    return out


def head_avgpool_fc_softmax(x, fc_w, fc_b, num_classes):
    """AdaptiveAvgPool2d(1) + Linear + softmax (f32).  fc_w/fc_b are padded to
    a 128-wide class axis at init (padded logits get bias -1e30 -> prob 0)."""
    n, h, w, c = x.shape
    x3 = x.reshape(n, h * w, c)
    npad = fc_w.shape[1]
    out = pl.pallas_call(
        _head_kernel,
        out_shape=jax.ShapeDtypeStruct((n, npad), jnp.float32),
        grid=(1,),
        in_specs=[pl.BlockSpec((n, h * w, c), lambda i: (0, 0, 0)),
                  pl.BlockSpec((c, npad), lambda i: (0, 0)),
                  pl.BlockSpec((1, npad), lambda i: (0, 0))],
        out_specs=pl.BlockSpec((n, npad), lambda i: (0, 0)),
    )(x3, fc_w, fc_b)
    return out[:, :num_classes]


# --------------------------------------------------------------------------
# Parameter construction (deterministic, synthetic; everything packed at init)
# --------------------------------------------------------------------------

def _fold_bn(gamma, beta, mean, var, eps=1e-5):
    scale = gamma / jnp.sqrt(var + eps)
    return scale, beta - mean * scale


def _s2d_weight(w):
    """Fold a stride-2 kxk conv weight (torch OIHW) into the equivalent
    stride-1 ceil(k/2) x ceil(k/2) weight acting on the space-to-depth(2) input."""
    cout, cin, k, _ = w.shape
    ka = (k + 1) // 2
    wpad = jnp.pad(w, ((0, 0), (0, 0), (0, 2 * ka - k), (0, 2 * ka - k)))
    wr = wpad.reshape(cout, cin, ka, 2, ka, 2)          # [co, c, a, r, b, s]
    w2 = jnp.transpose(wr, (0, 3, 5, 1, 2, 4))          # [co, r, s, c, a, b]
    return w2.reshape(cout, 4 * cin, ka, ka)


def _pack_conv_weight(w, ksize, stride):
    """(Cout, Cin, k, k) f32 torch layout -> (T, Cin_eff, Cout) bf16, once at init."""
    if stride == 2 and ksize > 1:
        w = _s2d_weight(w)
    ke = w.shape[-1]
    wt = jnp.transpose(w, (2, 3, 1, 0)).reshape(ke * ke, w.shape[1], w.shape[0])
    return wt.astype(jnp.bfloat16)


def _conv_bn_init(key, cin, cout, ksize, stride):
    kw_, kg, kb, km, kv = jax.random.split(key, 5)
    fan_in = cin * ksize * ksize
    w = jax.random.normal(kw_, (cout, cin, ksize, ksize), jnp.float32) \
        * np.sqrt(2.0 / fan_in)
    gamma = 1.0 + 0.1 * jax.random.normal(kg, (cout,), jnp.float32)
    beta = 0.1 * jax.random.normal(kb, (cout,), jnp.float32)
    mean = 0.1 * jax.random.normal(km, (cout,), jnp.float32)
    var = 1.0 + 0.1 * jax.random.uniform(kv, (cout,), jnp.float32)
    s, b = _fold_bn(gamma, beta, mean, var)
    return dict(w=_pack_conv_weight(w, ksize, stride),
                s=s.reshape(1, cout), b=b.reshape(1, cout))


def _bottleneck_init(key, inplanes, planes, stride, custom):
    # torchvision Bottleneck: width = planes; custom layer5 Bottleneck: width = 2*planes
    width = planes * 2 if custom else planes
    out_ch = planes * 4
    keys = jax.random.split(key, 4)
    p = dict(conv1=_conv_bn_init(keys[0], inplanes, width, 1, 1),
             conv2=_conv_bn_init(keys[1], width, width, 3, stride),
             conv3=_conv_bn_init(keys[2], width, out_ch, 1, 1))
    if stride != 1 or inplanes != out_ch:
        p['downsample'] = _conv_bn_init(keys[3], inplanes, out_ch, 1, stride)
    return p


def _make_layer(key, inplanes, planes, blocks, stride, custom=False):
    keys = jax.random.split(key, blocks)
    layer = []
    for i in range(blocks):
        s = stride if i == 0 else 1
        layer.append(_bottleneck_init(keys[i], inplanes, planes, s, custom))
        inplanes = planes * 4
    return layer, inplanes


def init_params(key, num_classes):
    ks = jax.random.split(key, 8)
    params = {}
    params['stem'] = _conv_bn_init(ks[0], 3, 64, 7, 2)          # conv1 7x7/2 + bn1
    inplanes = 64
    params['layer1'], inplanes = _make_layer(ks[1], inplanes, 64, 3, 1)
    params['layer2'], inplanes = _make_layer(ks[2], inplanes, 128, 4, 2)
    params['layer3'], inplanes = _make_layer(ks[3], inplanes, 256, 6, 2)
    params['layer4'], inplanes = _make_layer(ks[4], inplanes, 512, 3, 2)
    # custom layer5 from the PyTorch module: planes=256, 2 blocks, stride=1
    params['layer5'], inplanes = _make_layer(ks[5], inplanes, 256, 2, 1, custom=True)
    num_ftrs = 256 * 4
    kfw, kfb = jax.random.split(ks[6], 2)
    fc_w = jax.random.normal(kfw, (num_ftrs, num_classes), jnp.float32) \
        * np.sqrt(1.0 / num_ftrs)
    fc_b = 0.1 * jax.random.normal(kfb, (num_classes,), jnp.float32)
    npad = _rup(max(num_classes, 128), 128)
    params['fc_w'] = jnp.pad(fc_w, ((0, 0), (0, npad - num_classes)))
    params['fc_b'] = jnp.pad(fc_b.reshape(1, num_classes),
                             ((0, 0), (0, npad - num_classes)),
                             constant_values=-1e30)
    return params


# --------------------------------------------------------------------------
# Forward pass
# --------------------------------------------------------------------------

_LAYER_CFG = (('layer1', 1), ('layer2', 2), ('layer3', 2),
              ('layer4', 2), ('layer5', 1))


def bottleneck_forward(x, p, stride):
    out = conv2d_bn(x, p['conv1'], ksize=1, stride=1, pad=0, relu=True)
    out = conv2d_bn(out, p['conv2'], ksize=3, stride=stride, pad=1, relu=True)
    if 'downsample' in p:
        residual = conv2d_bn(x, p['downsample'], ksize=1, stride=stride, pad=0,
                             relu=False)
    else:
        residual = x
    # conv3 + bn3 + residual add + relu fused into one kernel epilogue
    return conv2d_bn(out, p['conv3'], ksize=1, stride=1, pad=0, relu=True,
                     residual=residual)


@functools.partial(jax.jit, static_argnames=('num_classes',))
def resnet50_forward(params, x_nchw, num_classes):
    x = jnp.transpose(x_nchw, (0, 2, 3, 1)).astype(jnp.bfloat16)   # NCHW -> NHWC bf16
    x = conv2d_bn(x, params['stem'], ksize=7, stride=2, pad=3, relu=True)
    x = maxpool_3x3_s2p1(x)
    for name, lstride in _LAYER_CFG:
        for bi, blk in enumerate(params[name]):
            x = bottleneck_forward(x, blk, lstride if bi == 0 else 1)
    return head_avgpool_fc_softmax(x, params['fc_w'], params['fc_b'], num_classes)


# --------------------------------------------------------------------------
# Lightweight numerical self-check of the fused conv kernel vs lax.conv
# --------------------------------------------------------------------------

def _ref_conv_bn(x_bf16, w, scale, bias, stride, pad, relu, residual=None):
    """f32 reference using the same bf16 operand rounding as the Pallas path."""
    xf = x_bf16.astype(jnp.float32)
    wf = w.astype(jnp.bfloat16).astype(jnp.float32)
    y = lax.conv_general_dilated(
        xf, jnp.transpose(wf, (2, 3, 1, 0)),
        window_strides=(stride, stride),
        padding=[(pad, pad), (pad, pad)],
        dimension_numbers=('NHWC', 'HWIO', 'NHWC'))
    y = y * scale.reshape(1, 1, 1, -1) + bias.reshape(1, 1, 1, -1)
    if residual is not None:
        y = y + residual.astype(jnp.float32)
    if relu:
        y = jnp.maximum(y, 0.0)
    return y


def _self_check_convs(key):
    cfgs = [  # (cin, cout, k, stride, pad, hw, with_residual)
        (64, 128, 1, 1, 0, 8, True),    # 1x1 conv (+fused residual + relu)
        (64, 512, 3, 1, 1, 8, False),   # 3x3 stride-1 conv, 2 Cout blocks
        (32, 64, 3, 2, 1, 8, False),    # 3x3 stride-2 conv (space-to-depth path)
        (3, 64, 7, 2, 3, 16, False),    # 7x7 stride-2 stem
        (64, 128, 1, 2, 0, 8, False),   # 1x1 stride-2 downsample
    ]
    for i, (cin, cout, k, st, pd, hw, use_res) in enumerate(cfgs):
        kk = jax.random.fold_in(key, i)
        kx, kw, kr, ks, kb = jax.random.split(kk, 5)
        x = jax.random.normal(kx, (2, hw, hw, cin), jnp.float32).astype(jnp.bfloat16)
        w = jax.random.normal(kw, (cout, cin, k, k), jnp.float32) \
            * np.sqrt(2.0 / (cin * k * k))
        scale = 1.0 + 0.1 * jax.random.normal(ks, (cout,), jnp.float32)
        bias = 0.1 * jax.random.normal(kb, (cout,), jnp.float32)
        ho = (hw + 2 * pd - k) // st + 1
        residual = None
        if use_res:
            residual = jax.random.normal(kr, (2, ho, ho, cout),
                                         jnp.float32).astype(jnp.bfloat16)
        p = dict(w=_pack_conv_weight(w, k, st),
                 s=scale.reshape(1, cout), b=bias.reshape(1, cout))
        got = conv2d_bn(x, p, ksize=k, stride=st, pad=pd, relu=True,
                        residual=residual).astype(jnp.float32)
        ref = _ref_conv_bn(x, w, scale, bias, st, pd, True, residual)
        np.testing.assert_allclose(np.asarray(got), np.asarray(ref),
                                   rtol=5e-2, atol=5e-2)


if __name__ == "__main__":
    num_classes = 10
    key = jax.random.PRNGKey(0)
    kp, kx, kc = jax.random.split(key, 3)

    # verify the fused conv kernel (1x1 / 3x3 / strided / stem / residual paths)
    _self_check_convs(kc)

    params = init_params(kp, num_classes)
    # small-but-valid input: batch=2, 3 channels, 64x64 spatial (NCHW like PyTorch)
    x = jax.random.normal(kx, (2, 3, 64, 64), jnp.float32)
    out = resnet50_forward(params, x, num_classes=num_classes)
    out = jax.block_until_ready(out)
    assert out.shape == (2, num_classes)
    assert bool(jnp.all(jnp.isfinite(out)))
    assert bool(jnp.allclose(jnp.sum(out, axis=1), 1.0, atol=1e-4))
    print("KERNEL_OK")
</pallas_src>

<mosaic_0001>
module attributes {stable_mosaic.version = 11 : i64} {
  func.func @_conv_bn_kernel(%arg0: i32, %arg1: memref<128x64xbf16, #tpu.memory_space<vmem>>, %arg2: memref<1x64x128xbf16, #tpu.memory_space<vmem>>, %arg3: memref<1x128xf32, #tpu.memory_space<vmem>>, %arg4: memref<1x128xf32, #tpu.memory_space<vmem>>, %arg5: memref<128x128xbf16, #tpu.memory_space<vmem>>, %arg6: memref<128x128xbf16, #tpu.memory_space<vmem>>, %arg7: memref<128x128xf32, #tpu.memory_space<vmem>>) attributes {dimension_semantics = [#tpu.dimension_semantics<parallel>], iteration_bounds = array<i64: 1>, scalar_prefetch = 0 : i64, scratch_operands = 1 : i64, tpu.core_type = #tpu.core_type<tc>, window_params = [{pipeline_mode = #tpu.pipeline_mode<synchronous>, transform_indices = @transform_0, window_bounds = array<i64: 128, 64>}, {transform_indices = @transform_1, window_bounds = array<i64: 1, 64, 128>}, {transform_indices = @transform_2, window_bounds = array<i64: 1, 128>}, {transform_indices = @transform_3, window_bounds = array<i64: 1, 128>}, {transform_indices = @transform_4, window_bounds = array<i64: 128, 128>}, {transform_indices = @transform_5, window_bounds = array<i64: 128, 128>}]} {
    %c0 = arith.constant 0 : index
    %c0_0 = arith.constant 0 : index
    %0 = vector.load %arg1[%c0, %c0_0] : memref<128x64xbf16, #tpu.memory_space<vmem>>, vector<128x64xbf16>
    %c0_1 = arith.constant 0 : index
    %c0_2 = arith.constant 0 : index
    %c0_3 = arith.constant 0 : index
    %1 = vector.load %arg2[%c0_1, %c0_2, %c0_3] : memref<1x64x128xbf16, #tpu.memory_space<vmem>>, vector<1x64x128xbf16>
    %2 = vector.shape_cast %1 : vector<1x64x128xbf16> to vector<64x128xbf16>
    %cst = arith.constant dense<0.000000e+00> : vector<128x128xf32>
    %3 = tpu.matmul %0, %2, %cst {dimension_numbers = #tpu.dot_dimension_numbers<[1], [0], [0], [1], [0, 0, 1, 1], [], []>} : vector<128x64xbf16>, vector<64x128xbf16>, vector<128x128xf32> -> vector<128x128xf32>
    %c0_4 = arith.constant 0 : index
    %c0_5 = arith.constant 0 : index
    %4 = vector.load %arg3[%c0_4, %c0_5] : memref<1x128xf32, #tpu.memory_space<vmem>>, vector<1x128xf32>
    %5 = vector.broadcast %4 : vector<1x128xf32> to vector<128x128xf32>
    %6 = arith.mulf %3, %5 : vector<128x128xf32>
    %c0_6 = arith.constant 0 : index
    %c0_7 = arith.constant 0 : index
    %7 = vector.load %arg4[%c0_6, %c0_7] : memref<1x128xf32, #tpu.memory_space<vmem>>, vector<1x128xf32>
    %8 = vector.broadcast %7 : vector<1x128xf32> to vector<128x128xf32>
    %9 = arith.addf %6, %8 : vector<128x128xf32>
    %c0_8 = arith.constant 0 : index
    %c0_9 = arith.constant 0 : index
    %10 = vector.load %arg5[%c0_8, %c0_9] : memref<128x128xbf16, #tpu.memory_space<vmem>>, vector<128x128xbf16>
    %11 = arith.extf %10 : vector<128x128xbf16> to vector<128x128xf32>
    %12 = arith.addf %9, %11 : vector<128x128xf32>
    %cst_10 = arith.constant 0.000000e+00 : f32
    %13 = vector.broadcast %cst_10 : f32 to vector<128x128xf32>
    %14 = arith.maximumf %12, %13 : vector<128x128xf32>
    %15 = arith.truncf %14 : vector<128x128xf32> to vector<128x128xbf16>
    %c0_11 = arith.constant 0 : index
    %c0_12 = arith.constant 0 : index
    %16 = vector.load %arg6[%c0_11, %c0_12] : memref<128x128xbf16, #tpu.memory_space<vmem>>, vector<128x128xbf16>
    tpu.vector_store %arg6[%c0_11, %c0_12], %15 {strides = array<i32>} : memref<128x128xbf16, #tpu.memory_space<vmem>>, vector<128x128xbf16>,
    return
  }
  func.func @transform_0(%arg0: i32) -> (i32, i32) {
    %c0_i32 = arith.constant 0 : i32
    %c0_i32_0 = arith.constant 0 : i32
    %c0_i32_1 = arith.constant 0 : i32
    return %c0_i32, %c0_i32_0 : i32, i32
  }
  func.func @transform_1(%arg0: i32) -> (i32, i32, i32) {
    %c0_i32 = arith.constant 0 : i32
    %c0_i32_0 = arith.constant 0 : i32
    %c0_i32_1 = arith.constant 0 : i32
    return %c0_i32, %c0_i32_0, %arg0 : i32, i32, i32
  }
  func.func @transform_2(%arg0: i32) -> (i32, i32) {
    %c0_i32 = arith.constant 0 : i32
    %c0_i32_0 = arith.constant 0 : i32
    return %c0_i32, %arg0 : i32, i32
  }
  func.func @transform_3(%arg0: i32) -> (i32, i32) {
    %c0_i32 = arith.constant 0 : i32
    %c0_i32_0 = arith.constant 0 : i32
    return %c0_i32, %arg0 : i32, i32
  }
  func.func @transform_4(%arg0: i32) -> (i32, i32) {
    %c0_i32 = arith.constant 0 : i32
    %c0_i32_0 = arith.constant 0 : i32
    return %c0_i32, %arg0 : i32, i32
  }
  func.func @transform_5(%arg0: i32) -> (i32, i32) {
    %c0_i32 = arith.constant 0 : i32
    %c0_i32_0 = arith.constant 0 : i32
    return %c0_i32, %arg0 : i32, i32
  }
}

</mosaic_0001>

<bundles_post_ra>
// kernel: tpu_custom_call.1
= control target key start
LH: loop header
LB: loop body
LE: loop exit
PB: predicated region body
PF: predicated region fallthrough
CT: control target
= control target key end

     0   :  { %vm110_vm0 = vcmask 523264   ;;  %s840_s0 = inlined_call_operand.vmem [shape: bf16[128,64], index: 0, kind: input, shape index: {}]   ;;  %s841_s1 = inlined_call_operand.vmem [shape: bf16[1,64,128], index: 1, kind: input, shape index: {}]   ;;  %s842_s2 = inlined_call_operand.vmem [shape: f32[1,128], index: 2, kind: input, shape index: {}]   ;;  %s843_s3 = inlined_call_operand.vmem [shape: f32[1,128], index: 3, kind: input, shape index: {}]   ;;  %s844_s4 = inlined_call_operand.vmem [shape: bf16[128,128], index: 4, kind: input, shape index: {}]   ;;  %s845_s5 = inlined_call_operand.hbm [shape: bf16[128,128], index: 5, kind: output, shape index: {}]  }
   0x1   :  { %v625_v0 = vld [vmem:[%s841_s1] sm:$0xff]   ;;  %v626_v1 = vld [vmem:[%s841_s1 + $0x8] sm:$0xff]   ;;  %v627_v2 = vld [vmem:[%s841_s1 + $0x10] sm:$0xff]  }
   0x2   :  { %590 = vmatprep.subr.bf16.mxu0 %v625_v0  ;;  %614 = vmatprep.subr.bf16.mxu1 %v625_v0  ;;  %v629_v3 = vld [vmem:[%s840_s0] sm:$0xff]   ;;  %v628_v5 = vld [vmem:[%s841_s1 + $0x18] sm:$0xff]  }
   0x3   :  { %591 = vmatpush3.bf16.msra.mxu0 %v625_v0  ;;  %618 = vmatpush3.bf16.msra.mxu1 %v625_v0  ;;  %v630_v4 = vld [vmem:[%s840_s0 + $0x20] sm:$0xff]  }
   0x4   :  { %592 = vmatprep.subr.bf16.mxu0 %v626_v1  ;;  %615 = vmatprep.subr.bf16.mxu1 %v626_v1 }
   0x5   :  { %598 = vmatprep.mubr.msk.bf16.mxu0 %vm110_vm0, %v629_v3  ;;  %606 = vmatprep.mubr.msk.bf16.mxu1 %vm110_vm0, %v630_v4 }
   0x7   :  { %593 = vmatpush3.bf16.msra.mxu0 %v626_v1  ;;  %619 = vmatpush3.bf16.msra.mxu1 %v626_v1 }
   0x8   :  { %594 = vmatprep.subr.bf16.mxu0 %v627_v2  ;;  %616 = vmatprep.subr.bf16.mxu1 %v627_v2 }
   0xb   :  { %595 = vmatpush3.bf16.msra.mxu0 %v627_v2  ;;  %620 = vmatpush3.bf16.msra.mxu1 %v627_v2 }
   0xc   :  { %596 = vmatprep.subr.bf16.mxu0 %v628_v5  ;;  %617 = vmatprep.subr.bf16.mxu1 %v628_v5 }
   0xd   :  { %10 = vsyncpa [#allocation4], 0  ;;  %v631_v6 = vld [vmem:[%s840_s0 + $0x8] sm:$0xff]   ;;  %v633_v8 = vld [vmem:[%s840_s0 + $0x10] sm:$0xff]  }
   0xe   :  { %v632_v7 = vld [vmem:[%s840_s0 + $0x28] sm:$0xff]   ;;  %v634_v9 = vld [vmem:[%s840_s0 + $0x30] sm:$0xff]   ;;  %v635_v10 = vld [vmem:[%s840_s0 + $0x18] sm:$0xff]  }
   0xf   :  { %597 = vmatpush3.bf16.msra.mxu0 %v628_v5  ;;  %621 = vmatpush3.bf16.msra.mxu1 %v628_v5  ;;  %v636_v11 = vld [vmem:[%s840_s0 + $0x38] sm:$0xff]   ;;  %v564_v12 = vld [vmem:[%s844_s4 + $0x8] sm:$0xff]   ;;  %v493_v14 = vld [vmem:[%s844_s4] sm:$0xff]  }
  0x10   :  { %v568_v13 = vld [vmem:[%s844_s4 + $0x28] sm:$0xff]   ;;  %v567_v15 = vld [vmem:[%s844_s4 + $0x20] sm:$0xff]   ;;  %v758_v17 = vld [vmem:[%s844_s4 + $0x18] sm:$0xff]   ;;  %v498_v19 = vunpack.c.l.bf16 %v564_v12  ;;  %v494_v21 = vunpack.c.l.bf16 %v493_v14  ;;  %v499_v28 = vunpack.c.h.bf16 %v564_v12  ;;  %v495_v30 = vunpack.c.h.bf16 %v493_v14 }
  0x11   :  { %v753_v16 = vld [vmem:[%s842_s2] ss:$0 sm:$0xff]  ;;  %v763_v18 = vld [vmem:[%s844_s4 + $0x38] sm:$0xff]   ;;  %v514_v20 = vunpack.c.l.bf16 %v568_v13  ;;  %v510_v22 = vunpack.c.l.bf16 %v567_v15  ;;  %v768_v23 = vld [vmem:[%s844_s4 + $0x10] sm:$0xff]   ;;  %v515_v29 = vunpack.c.h.bf16 %v568_v13  ;;  %v511_v31 = vunpack.c.h.bf16 %v567_v15 }
  0x12   :  { %599 = vmatmul.mubr.msk.bf16.vlgmr.msra.gmra.mrb[0].mxu0 %vm110_vm0, %v631_v6  ;;  %607 = vmatmul.mubr.msk.bf16.vlgmr.msra.gmra.mrb[0].mxu1 %vm110_vm0, %v632_v7  ;;  %v773_v24 = vld [vmem:[%s844_s4 + $0x30] sm:$0xff]   ;;  %v778_v26 = vld [vmem:[%s843_s3] ss:$0 sm:$0xff]  ;;  %v506_v36 = vunpack.c.l.bf16 %v758_v17  ;;  %v522_v37 = vunpack.c.l.bf16 %v763_v18  ;;  %v502_v42 = vunpack.c.l.bf16 %v768_v23  ;;  %s661_s3 = smov [#allocation3]  }
  0x13   :  { %602 = vmatprep.mubr.msk.bf16.mxu0 %vm110_vm0, %v633_v8  ;;  %610 = vmatprep.mubr.msk.bf16.mxu1 %vm110_vm0, %v634_v9  ;;  %v518_v43 = vunpack.c.l.bf16 %v773_v24  ;;  %s427_s4 = sshll.u32 %s661_s3, 4  ;;  %s428_s4 = int_to_ptr.vmem [resolvable:$true] %s427_s4 }
  0x14   :  { %s637_s9 = scalar_lea.vmem %s428_s4, 1024  ;;  %p642_p1 = scmp.lt.s32.totalorder %s428_s4, %s428_s4 }
  0x15   :  { %p638_p0 = scmp.ne.s32.totalorder %s428_s4, %s637_s9  ;;  %p643_p2 = scmp.lt.s32.totalorder %s637_s9, %s637_s9 }
  0x17   :  { %p644_p3 = por %p643_p2, %p642_p1 }
  0x19   :  { %p645_p4 = pnand %p644_p3, %p638_p0 }
  0x1a   :  { %603 = vmatmul.mubr.msk.bf16.gmra.mrb[4].mxu0 %vm110_vm0, %v635_v10  ;;  %611 = vmatmul.mubr.msk.bf16.gmra.mrb[4].mxu1 %vm110_vm0, %v636_v11 }
  0xe5   :  { %v600_v25 = vpop.f32.mrb[0].mxu0  ;;  %v608_v27 = vpop.f32.mrb[0].mxu1 }
  0xe6   :  { %v241_v32 = vmul.f32 %v600_v25, %v753_v16  ;;  %v249_v33 = vmul.f32 %v608_v27, %v753_v16  ;;  %v169_v34 = vpop.f32.mrb[1].mxu0  ;;  %v201_v35 = vpop.f32.mrb[1].mxu1 }
  0xe7   :  { %v239_v38 = vmul.f32 %v753_v16, %v169_v34  ;;  %v247_v39 = vmul.f32 %v753_v16, %v201_v35  ;;  %v601_v40 = vpop.f32.mrb[2].mxu0  ;;  %v609_v41 = vpop.f32.mrb[2].mxu1 }
  0xe8   :  { %v264_v44 = vadd.f32 %v778_v26, %v241_v32  ;;  %v272_v45 = vadd.f32 %v778_v26, %v249_v33  ;;  %v242_v46 = vmul.f32 %v601_v40, %v753_v16  ;;  %v250_v47 = vmul.f32 %v609_v41, %v753_v16  ;;  %v172_v48 = vpop.f32.mrb[3].mxu0  ;;  %v204_v49 = vpop.f32.mrb[3].mxu1 }
  0xe9   :  { %v262_v50 = vadd.f32 %v778_v26, %v239_v38  ;;  %v270_v51 = vadd.f32 %v778_v26, %v247_v39  ;;  %v240_v52 = vmul.f32 %v753_v16, %v172_v48  ;;  %v248_v53 = vmul.f32 %v753_v16, %v204_v49 }
  0xea   :  { %v312_v54 = vadd.f32 %v498_v19, %v264_v44  ;;  %v320_v55 = vadd.f32 %v514_v20, %v272_v45  ;;  %v265_v56 = vadd.f32 %v778_v26, %v242_v46  ;;  %v273_v57 = vadd.f32 %v778_v26, %v250_v47 }
  0xeb   :  { %v310_v58 = vadd.f32 %v494_v21, %v262_v50  ;;  %v318_v59 = vadd.f32 %v510_v22, %v270_v51  ;;  %v263_v60 = vadd.f32 %v778_v26, %v240_v52  ;;  %v271_v61 = vadd.f32 %v778_v26, %v248_v53 }
  0xec   :  { %v328_v62 = vmax.f32 %v312_v54, 0.0  ;;  %v336_v63 = vmax.f32 %v320_v55, 0.0  ;;  %v313_v0 = vadd.f32 %v499_v28, %v265_v56  ;;  %v321_v1 = vadd.f32 %v515_v29, %v273_v57 }
  0xed   :  { %v326_v2 = vmax.f32 %v310_v58, 0.0  ;;  %v334_v3 = vmax.f32 %v318_v59, 0.0  ;;  %v311_v4 = vadd.f32 %v495_v30, %v263_v60  ;;  %v319_v5 = vadd.f32 %v511_v31, %v271_v61  ;;  %v604_v6 = vpop.f32.mrb[4].mxu0  ;;  %v612_v7 = vpop.f32.mrb[4].mxu1 }
  0xee   :  { %v329_v8 = vmax.f32 %v313_v0, 0.0  ;;  %v337_v9 = vmax.f32 %v321_v1, 0.0  ;;  %v245_v10 = vmul.f32 %v604_v6, %v753_v16  ;;  %v253_v11 = vmul.f32 %v612_v7, %v753_v16  ;;  %v185_v12 = vpop.f32.mrb[5].mxu0  ;;  %v217_v13 = vpop.f32.mrb[5].mxu1 }
  0xef   :  { %v327_v14 = vmax.f32 %v311_v4, 0.0  ;;  %v335_v15 = vmax.f32 %v319_v5, 0.0  ;;  %v243_v19 = vmul.f32 %v753_v16, %v185_v12  ;;  %v251_v20 = vmul.f32 %v753_v16, %v217_v13  ;;  %v605_v21 = vpop.f32.mrb[6].mxu0  ;;  %v613_v22 = vpop.f32.mrb[6].mxu1 }
  0xf0   :  { %v532_v25 = vpack.c.bf16 %v329_v8, %v328_v62  ;;  %v552_v27 = vpack.c.bf16 %v337_v9, %v336_v63  ;;  %v268_v28 = vadd.f32 %v778_v26, %v245_v10  ;;  %v276_v29 = vadd.f32 %v778_v26, %v253_v11  ;;  %v188_v30 = vpop.f32.mrb[7].mxu0  ;;  %v220_v31 = vpop.f32.mrb[7].mxu1 }
  0xf1   :  { %v527_v32 = vpack.c.bf16 %v327_v14, %v326_v2  ;;  %v547_v33 = vpack.c.bf16 %v335_v15, %v334_v3  ;;  %v266_v34 = vadd.f32 %v778_v26, %v243_v19  ;;  %v274_v35 = vadd.f32 %v778_v26, %v251_v20 }
  0xf2   :  { %571 = vst [vmem:[#allocation3 + $0x8] sm:$0xff] %v532_v25   ;;  %575 = vst [vmem:[#allocation3 + $0x28] sm:$0xff] %v552_v27   ;;  %v246_v38 = vmul.f32 %v605_v21, %v753_v16  ;;  %v507_v39 = vunpack.c.h.bf16 %v758_v17  ;;  %v254_v40 = vmul.f32 %v613_v22, %v753_v16  ;;  %v523_v41 = vunpack.c.h.bf16 %v763_v18 }
  0xf3   :  { %528 = vst [vmem:[#allocation3] sm:$0xff] %v527_v32   ;;  %574 = vst [vmem:[#allocation3 + $0x20] sm:$0xff] %v547_v33   ;;  %v244_v44 = vmul.f32 %v753_v16, %v188_v30  ;;  %v503_v45 = vunpack.c.h.bf16 %v768_v23  ;;  %v252_v46 = vmul.f32 %v753_v16, %v220_v31  ;;  %v519_v47 = vunpack.c.h.bf16 %v773_v24 }
  0xf4   :  { %v316_v48 = vadd.f32 %v506_v36, %v268_v28  ;;  %v324_v49 = vadd.f32 %v522_v37, %v276_v29  ;;  %v269_v50 = vadd.f32 %v778_v26, %v246_v38  ;;  %v277_v51 = vadd.f32 %v778_v26, %v254_v40 }
  0xf5   :  { %v314_v52 = vadd.f32 %v502_v42, %v266_v34  ;;  %v322_v53 = vadd.f32 %v518_v43, %v274_v35  ;;  %v267_v16 = vadd.f32 %v778_v26, %v244_v44  ;;  %v275_v54 = vadd.f32 %v778_v26, %v252_v46 }
  0xf6   :  { %v317_v55 = vadd.f32 %v507_v39, %v269_v50  ;;  %v325_v17 = vadd.f32 %v523_v41, %v277_v51  ;;  %v332_v18 = vmax.f32 %v316_v48, 0.0  ;;  %v340_v37 = vmax.f32 %v324_v49, 0.0 }
  0xf7   :  { %v315_v36 = vadd.f32 %v503_v45, %v267_v16  ;;  %v323_v56 = vadd.f32 %v519_v47, %v275_v54  ;;  %v330_v59 = vmax.f32 %v314_v52, 0.0  ;;  %v338_v23 = vmax.f32 %v322_v53, 0.0 }
  0xf8   :  { %v333_v57 = vmax.f32 %v317_v55, 0.0  ;;  %v341_v58 = vmax.f32 %v325_v17, 0.0 }
  0xf9   :  { %v331_v42 = vmax.f32 %v315_v36, 0.0  ;;  %v339_v60 = vmax.f32 %v323_v56, 0.0 }
  0xfa   :  { %v542_v24 = vpack.c.bf16 %v333_v57, %v332_v18  ;;  %v562_v43 = vpack.c.bf16 %v341_v58, %v340_v37 }
  0xfb   :  { %v537_v61 = vpack.c.bf16 %v331_v42, %v330_v59  ;;  %v557_v62 = vpack.c.bf16 %v339_v60, %v338_v23 }
  0xfc   :  { %573 = vst [vmem:[#allocation3 + $0x18] sm:$0xff] %v542_v24   ;;  %577 = vst [vmem:[#allocation3 + $0x38] sm:$0xff] %v562_v43  }
  0xfd   :  { %572 = vst [vmem:[#allocation3 + $0x10] sm:$0xff] %v537_v61   ;;  %576 = vst [vmem:[#allocation3 + $0x30] sm:$0xff] %v557_v62  }
  0xfe   :  { %648 = shalt.err (!%p645_p4)
}
  0xff   :  { %s649_s11 = scalar_lea.hbm %s845_s5, 1024 }
 0x100   :  { %p650_p5 = scmp.ne.s32.totalorder %s845_s5, %s649_s11  ;;  %p653_p6 = scmp.lt.u32.totalorder %s649_s11, %s845_s5 }
 0x102   :  { %p655_p7 = pnand %p653_p6, %p650_p5 }
 0x104   :  { %658 = shalt.err (!%p655_p7)
}
 0x105   :  { %s662_s16 = smov 64   ;;  %s663_s17 = smov 4  }
 0x106   :  { %433 = dma.vmem_to_hbm [thread:$0]  %s428_s4, 1024, %s845_s5, [#allocation4], %s662_s16, %s662_s16, %s663_s17  }
 0x107   :  { %659 = dma.done.wait [#allocation4], 1024  }
 0x108   :  { %660 = vsyncadd [#allocation4], 4294966272 }
 0x109   :  { %437 = vsyncpa [#allocation4], 1 }

</bundles_post_ra>
